<compile_context>
chip_gen: v6e
topology: v6e:2x2x1
jax: 0.10.0
libtpu: 0.0.40
codegen_flags: <defaults>
</compile_context>

<pallas_src>
import math

import jax
import jax.numpy as jnp
from jax.experimental import pallas as pl
from jax.experimental.pallas import tpu as pltpu


def _resample_kernel(x_ref, w_ref, o_ref):
    # x_ref: (TB, L*F), w_ref: (L*F, new_L*F)  [= (W ⊗ I_F)^T, f32],
    # o_ref: (TB, new_L*F).  Single lane-dense MXU matmul, f32 accumulation.
    o_ref[...] = jnp.dot(
        x_ref[...].astype(jnp.float32),
        w_ref[...],
        preferred_element_type=jnp.float32,
    ).astype(o_ref.dtype)


def _interp_matrix(seq_len, new_seq_len):
    """Dense (new_seq_len, seq_len) linear-interp matrix, align_corners=True, f32."""
    if new_seq_len == 1:
        src = jnp.zeros((1,), jnp.float32)
    else:
        src = jnp.arange(new_seq_len, dtype=jnp.float32) * (
            (seq_len - 1) / (new_seq_len - 1)
        )
    lo = jnp.clip(jnp.floor(src).astype(jnp.int32), 0, seq_len - 1)
    hi = jnp.clip(lo + 1, 0, seq_len - 1)
    frac = src - lo.astype(jnp.float32)
    # Rows always sum to 1 (lo==hi at the clipped endpoint collapses to weight 1).
    w = (
        jax.nn.one_hot(lo, seq_len, dtype=jnp.float32) * (1.0 - frac)[:, None]
        + jax.nn.one_hot(hi, seq_len, dtype=jnp.float32) * frac[:, None]
    )
    return w  # float32, never quantized to the input dtype


def _kron_weight_T(seq_len, new_seq_len, feat):
    """(L*F, new_L*F) = (W ⊗ I_F)^T so that  x2 @ WkT  interpolates along L."""
    w = _interp_matrix(seq_len, new_seq_len)            # (new_L, L), f32
    eye = jnp.eye(feat, dtype=jnp.float32)
    # result[j*F+f, i*F+g] = W[i, j] * delta(f, g)
    wkT = jnp.einsum("ij,fg->jfig", w, eye)
    return wkT.reshape(seq_len * feat, new_seq_len * feat)


def _pick_batch_tile(batch, lf, nf):
    """Largest batch tile whose double-buffered blocks fit a conservative VMEM budget."""
    budget = 12 * 1024 * 1024            # bytes; safe on v7x (64 MiB phys / 32 MiB scoped)
    w_bytes = lf * nf * 4 * 2            # resident (double-buffered) weight block
    avail = max(budget - w_bytes, 1 * 1024 * 1024)
    per_row = (lf + nf) * 4 * 2          # double-buffered input + output rows, f32
    tb = max(1, avail // per_row)
    if tb >= batch:
        return batch                     # single block covers the whole batch
    return max(8, (tb // 8) * 8)         # keep (8,128) tiling constraint happy


def resample(x, original_fps, new_fps):
    """JAX/Pallas equivalent of Resample.forward."""
    orig_ndim = x.ndim
    if orig_ndim == 4:
        B, L, N, D = x.shape
        F = N * D
        x2 = x.reshape(B, L, F)          # free reshape, NO transpose needed
    else:
        B, L, F = x.shape
        x2 = x

    new_L = math.ceil(L * new_fps / original_fps)
    LF, NF = L * F, new_L * F

    wkT = _kron_weight_T(L, new_L, F)    # (LF, NF), float32
    x_flat = x2.reshape(B, LF)           # free reshape: seq/feat are adjacent

    TB = _pick_batch_tile(B, LF, NF)
    grid = (pl.cdiv(B, TB),)

    out_flat = pl.pallas_call(
        _resample_kernel,
        out_shape=jax.ShapeDtypeStruct((B, NF), x.dtype),
        grid=grid,
        in_specs=[
            pl.BlockSpec((TB, LF), lambda b: (b, 0)),   # batch tile, lane-dense rows
            pl.BlockSpec((LF, NF), lambda b: (0, 0)),   # weight resident across grid
        ],
        out_specs=pl.BlockSpec((TB, NF), lambda b: (b, 0)),
        compiler_params=pltpu.CompilerParams(
            dimension_semantics=("parallel",),          # megacore split on v7x
            vmem_limit_bytes=32 * 1024 * 1024,
        ),
    )(x_flat, wkT)

    out = out_flat.reshape(B, new_L, F)
    if orig_ndim == 4:
        out = out.reshape(B, new_L, N, D)               # free reshape, NO transpose
    return out


def _resample_ref(x, original_fps, new_fps):
    """Pure-JAX reference (mirrors the PyTorch semantics) for verification."""
    orig_ndim = x.ndim
    if orig_ndim == 4:
        B, L, N, D = x.shape
        x2 = x.reshape(B, L, N * D)
    else:
        x2 = x
        B, L, _ = x.shape
    new_L = math.ceil(L * new_fps / original_fps)
    w = _interp_matrix(L, new_L)
    out = jnp.einsum("ij,bjf->bif", w, x2.astype(jnp.float32)).astype(x.dtype)
    if orig_ndim == 4:
        out = out.reshape(B, new_L, N, D)
    return out


if __name__ == "__main__":
    # Module "parameters" (deterministic, set in-script).
    original_fps = 30
    new_fps = 20

    key = jax.random.PRNGKey(0)
    k3, k4, k5 = jax.random.split(key, 3)

    # 3-D case: (batch_size, seq_len, 2)
    x3 = jax.random.normal(k3, (2, 16, 2), dtype=jnp.float32)
    # 4-D case: (B, L, N, D)
    x4 = jax.random.normal(k4, (2, 16, 4, 2), dtype=jnp.float32)
    # Slightly larger batch to exercise the batched single-matmul path.
    x5 = jax.random.normal(k5, (10, 16, 2), dtype=jnp.float32)

    new_L = math.ceil(16 * new_fps / original_fps)

    y3 = jax.block_until_ready(resample(x3, original_fps, new_fps))
    y4 = jax.block_until_ready(resample(x4, original_fps, new_fps))
    y5 = jax.block_until_ready(resample(x5, original_fps, new_fps))

    r3 = _resample_ref(x3, original_fps, new_fps)
    r4 = _resample_ref(x4, original_fps, new_fps)
    r5 = _resample_ref(x5, original_fps, new_fps)

    assert y3.shape == (2, new_L, 2), y3.shape
    assert y4.shape == (2, new_L, 4, 2), y4.shape
    assert y5.shape == (10, new_L, 2), y5.shape
    assert jnp.allclose(y3, r3, atol=1e-5, rtol=1e-5)
    assert jnp.allclose(y4, r4, atol=1e-5, rtol=1e-5)
    assert jnp.allclose(y5, r5, atol=1e-5, rtol=1e-5)

    print("KERNEL_OK")
</pallas_src>

<mosaic_0001>
module attributes {stable_mosaic.version = 11 : i64} {
  func.func @_resample_kernel(%arg0: i32, %arg1: memref<2x32xf32, #tpu.memory_space<vmem>>, %arg2: memref<32x22xf32, #tpu.memory_space<vmem>>, %arg3: memref<2x22xf32, #tpu.memory_space<vmem>>) attributes {dimension_semantics = [#tpu.dimension_semantics<parallel>], iteration_bounds = array<i64: 1>, scalar_prefetch = 0 : i64, scratch_operands = 0 : i64, tpu.core_type = #tpu.core_type<tc>, window_params = [{transform_indices = @transform_0, window_bounds = array<i64: 2, 32>}, {pipeline_mode = #tpu.pipeline_mode<synchronous>, transform_indices = @transform_1, window_bounds = array<i64: 32, 22>}, {transform_indices = @transform_2, window_bounds = array<i64: 2, 22>}]} {
    %c0 = arith.constant 0 : index
    %c0_0 = arith.constant 0 : index
    %0 = vector.load %arg1[%c0, %c0_0] : memref<2x32xf32, #tpu.memory_space<vmem>>, vector<2x32xf32>
    %c0_1 = arith.constant 0 : index
    %c0_2 = arith.constant 0 : index
    %1 = vector.load %arg2[%c0_1, %c0_2] : memref<32x22xf32, #tpu.memory_space<vmem>>, vector<32x22xf32>
    %cst = arith.constant dense<0.000000e+00> : vector<2x22xf32>
    %2 = tpu.matmul %0, %1, %cst {dimension_numbers = #tpu.dot_dimension_numbers<[1], [0], [0], [1], [0, 0, 1, 1], [], []>} : vector<2x32xf32>, vector<32x22xf32>, vector<2x22xf32> -> vector<2x22xf32>
    %c0_3 = arith.constant 0 : index
    %c0_4 = arith.constant 0 : index
    %3 = vector.load %arg3[%c0_3, %c0_4] : memref<2x22xf32, #tpu.memory_space<vmem>>, vector<2x22xf32>
    tpu.vector_store %arg3[%c0_3, %c0_4], %2 {strides = array<i32>} : memref<2x22xf32, #tpu.memory_space<vmem>>, vector<2x22xf32>,
    return
  }
  func.func @transform_0(%arg0: i32) -> (i32, i32) {
    %c0_i32 = arith.constant 0 : i32
    %c0_i32_0 = arith.constant 0 : i32
    return %arg0, %c0_i32 : i32, i32
  }
  func.func @transform_1(%arg0: i32) -> (i32, i32) {
    %c0_i32 = arith.constant 0 : i32
    %c0_i32_0 = arith.constant 0 : i32
    %c0_i32_1 = arith.constant 0 : i32
    return %c0_i32, %c0_i32_0 : i32, i32
  }
  func.func @transform_2(%arg0: i32) -> (i32, i32) {
    %c0_i32 = arith.constant 0 : i32
    %c0_i32_0 = arith.constant 0 : i32
    return %arg0, %c0_i32 : i32, i32
  }
}

</mosaic_0001>

<bundles_post_ra>
// kernel: tpu_custom_call.1
= control target key start
LH: loop header
LB: loop body
LE: loop exit
PB: predicated region body
PF: predicated region fallthrough
CT: control target
= control target key end

     0   :  { %v149_v1 = vmov 0.0   ;;  %vm150_vm0 = vmmov 0   ;;  %s185_s0 = inlined_call_operand.vmem [shape: f32[2,32], index: 0, kind: input, shape index: {}]   ;;  %s186_s1 = inlined_call_operand.vmem [shape: f32[32,22], index: 1, kind: input, shape index: {}]   ;;  %s187_s2 = inlined_call_operand.hbm [shape: f32[2,22], index: 2, kind: output, shape index: {}]  }
   0x1   :  { %v16_v0 = vld [vmem:[%s186_s1 + $0x18] sm:$0xff]  ;;  %113 = vmatprep.subr.mxu0 %v149_v1  ;;  %v15_v2 = vld [vmem:[%s186_s1 + $0x10] sm:$0xff]  ;;  %121 = vmatprep.mubr.msk.f32.mxu0 %vm150_vm0, %v149_v1 }
   0x2   :  { %7 = vsyncpa [#allocation3], 0  ;;  %114 = vmatpush3.msra.mxu0 %v16_v0  ;;  %v14_v3 = vld [vmem:[%s186_s1 + $0x8] sm:$0xff]  ;;  %v13_v4 = vld [vmem:[%s186_s1] sm:$0xff]  ;;  %vm17_vm1 = vcmask 261120   ;;  %s151_s19 = smov [#allocation2]  }
   0x3   :  { %115 = vmatprep.subr.mxu0 %v149_v1  ;;  %v12_v5 = vld [vmem:[%s185_s0] sm:$0x3]  ;;  %s99_s20 = sshll.u32 %s151_s19, 4  ;;  %vm91_vm2 = vcmask 173056   ;;  %s100_s20 = int_to_ptr.vmem [resolvable:$true] %s99_s20 }
   0x4   :  { %116 = vmatpush3.msra.mxu0 %v15_v2  ;;  %s127_s21 = scalar_lea.vmem %s100_s20, 32  ;;  %p132_p1 = scmp.lt.s32.totalorder %s100_s20, %s100_s20 }
   0x5   :  { %117 = vmatprep.subr.mxu0 %v149_v1  ;;  %p128_p0 = scmp.ne.s32.totalorder %s100_s20, %s127_s21  ;;  %p133_p2 = scmp.lt.s32.totalorder %s127_s21, %s127_s21 }
   0x6   :  { %118 = vmatpush3.msra.mxu0 %v14_v3 }
   0x7   :  { %119 = vmatprep.subr.mxu0 %v149_v1  ;;  %p134_p3 = por %p133_p2, %p132_p1 }
   0x8   :  { %120 = vmatpush3.msra.mxu0 %v13_v4 }
   0x9   :  { %122 = vmatmul.mubr.msk.f32.vlgmr.msra.gmra.mxu0 %vm17_vm1, %v12_v5  ;;  %p135_p4 = pnand %p134_p3, %p128_p0 }
  0xc9   :  { %v87_v6 = vpop.f32.mrf.mxu0 }
  0xca   :  { %92 = vst.msk [vmem:[#allocation2] sm:$0x3] %vm91_vm2, %v87_v6 }
  0xcb   :  { %v123_v7 = vpop.f32.mrf.mxu0 }
  0xcc   :  { %138 = shalt.err (!%p135_p4)
}
  0xcd   :  { %102 = dma.vmem_to_hbm [thread:$0]  %s100_s20, 32, %s187_s2, [#allocation3]  }
  0xce   :  { %147 = dma.done.wait [#allocation3], 32  }
  0xcf   :  { %148 = vsyncadd [#allocation3], 4294967264 }
  0xd0   :  { %106 = vsyncpa [#allocation3], 1 }

</bundles_post_ra>
